<compile_context>
chip_gen: v6e
topology: v6e:2x2x1
jax: 0.10.0
libtpu: 0.0.40
codegen_flags: <defaults>
</compile_context>

<pallas_src>
import math

import jax
import jax.numpy as jnp
from jax.experimental import pallas as pl
from jax.experimental.pallas import tpu as pltpu


# ---------------------------------------------------------------------------
# kernel helpers (shared by all variants)
# ---------------------------------------------------------------------------

def _gru_gi(x, wih, bg):
    """gi = W_ih @ x + b_g in the transposed layout (gate-rows x N-lanes).

    For tiny K (input_size <= 8) use K VPU broadcast FMAs instead of an MXU
    matmul: K=4 fills only 4/128 of the MXU depth and still pays the result-FIFO
    pop; the VPU path leaves the vex slot free for the W_hh matmul.
    """
    k_dim = x.shape[0]
    if k_dim <= 8:
        gi = wih[:, 0:1] * x[0:1, :]
        for k in range(1, k_dim):
            gi = gi + wih[:, k:k + 1] * x[k:k + 1, :]
    else:
        gi = jnp.dot(wih, x, preferred_element_type=jnp.float32)
    return gi + bg


def _aggregate(h_new, wagg, bagg):
    """Aggregator Linear + Softplus; lane-dense (out_size, TN) output."""
    out_size = wagg.shape[1]
    if out_size == 1:
        # VPU multiply + sublane (XLU) reduction: no MXU round trip for a 1-wide output.
        agg = jnp.sum(wagg * h_new, axis=0, keepdims=True)
    else:
        # (out, H) x (H, TN) contraction on H, result stays lane-dense.
        agg = jax.lax.dot_general(wagg, h_new, (((0,), (0,)), ((), ())),
                                  preferred_element_type=jnp.float32)
    return jax.nn.softplus(agg + bagg)


def _gru_update(gi, gh, h, bhn, H):
    """Full GRU gate math given gi = W_ih x + b_g and gh = W_hh h."""
    r = jax.nn.sigmoid(gi[0:H] + gh[0:H])
    z = jax.nn.sigmoid(gi[H:2 * H] + gh[H:2 * H])
    n = jnp.tanh(gi[2 * H:3 * H] + r * (gh[2 * H:3 * H] + bhn))
    return (1.0 - z) * n + z * h


def _gru_update_h0(gi, bhn, H):
    """GRU gate math for h0 == 0 (gh == 0, only b_hh survives; + z*h drops)."""
    r = jax.nn.sigmoid(gi[0:H])
    z = jax.nn.sigmoid(gi[H:2 * H])
    n = jnp.tanh(gi[2 * H:3 * H] + r * bhn)
    return (1.0 - z) * n


# ---------------------------------------------------------------------------
# kernels
# ---------------------------------------------------------------------------

def gru_step_kernel(x_ref, h_ref, wih_ref, whh_ref, bg_ref, bhn_ref,
                    wagg_ref, bagg_ref, out_ref, hnew_ref):
    """Fused GRUCell + Linear + Softplus; batch N on the 128-lane axis.

    x_ref   : (input_size, TN)
    h_ref   : (H, TN)           previous hidden state
    wih_ref : (3H, input_size)  PyTorch weight_ih layout, gate order [r, z, n]
    whh_ref : (3H, H)           PyTorch weight_hh layout
    bg_ref  : (3H, 1)           b_ih+b_hh for r,z rows; b_ih only for n rows
    bhn_ref : (H, 1)            b_hh for the n rows
    wagg_ref: (H, out_size)
    bagg_ref: (out_size, 1)
    out_ref : (out_size, TN)    lane-dense output
    hnew_ref: (H, TN)           new hidden state (self.storage)
    """
    H = hnew_ref.shape[0]
    h = h_ref[...]
    gi = _gru_gi(x_ref[...], wih_ref[...], bg_ref[...])                     # (3H, TN)
    gh = jnp.dot(whh_ref[...], h, preferred_element_type=jnp.float32)       # (3H, TN)
    h_new = _gru_update(gi, gh, h, bhn_ref[...], H)
    hnew_ref[...] = h_new
    out_ref[...] = _aggregate(h_new, wagg_ref[...], bagg_ref[...])


def gru_step0_kernel(x_ref, wih_ref, bg_ref, bhn_ref, wagg_ref, bagg_ref,
                     out_ref, hnew_ref):
    """First raymarch step (self.storage is None, h0 == 0): the h0 input DMA
    and the W_hh matmul are skipped entirely."""
    H = hnew_ref.shape[0]
    gi = _gru_gi(x_ref[...], wih_ref[...], bg_ref[...])
    h_new = _gru_update_h0(gi, bhn_ref[...], H)
    hnew_ref[...] = h_new
    out_ref[...] = _aggregate(h_new, wagg_ref[...], bagg_ref[...])


def gru_rollout_kernel(x_ref, wih_ref, whh_ref, bg_ref, bhn_ref,
                       wagg_ref, bagg_ref, out_ref, hfin_ref, h_scr):
    """Fused T-step raymarch.  grid = (n_tiles, T), T innermost ("arbitrary").
    The hidden state lives in VMEM scratch (h_scr) across the T steps of each
    lane-tile, so it never round-trips through HBM between steps.

    x_ref   : (input_size, TN)   per-step input tile (leading T axis squeezed)
    out_ref : (out_size, TN)     per-step output tile (leading T axis squeezed)
    hfin_ref: (H, TN)            final hidden state (written once per tile)
    h_scr   : (H, TN)            resident hidden state
    """
    t = pl.program_id(1)
    H = hfin_ref.shape[0]
    gi = _gru_gi(x_ref[...], wih_ref[...], bg_ref[...])

    @pl.when(t == 0)
    def _():
        h_scr[...] = _gru_update_h0(gi, bhn_ref[...], H)

    @pl.when(t > 0)
    def _():
        h = h_scr[...]
        gh = jnp.dot(whh_ref[...], h, preferred_element_type=jnp.float32)
        h_scr[...] = _gru_update(gi, gh, h, bhn_ref[...], H)

    h_new = h_scr[...]
    out_ref[...] = _aggregate(h_new, wagg_ref[...], bagg_ref[...])

    @pl.when(t == pl.num_programs(1) - 1)
    def _():
        hfin_ref[...] = h_new


# ---------------------------------------------------------------------------
# wrappers
# ---------------------------------------------------------------------------

_VMEM_LIMIT = 32 * 1024 * 1024   # explicit; tiny footprint, fits all generations


def _pick_tiling(n, max_tile_n=2048):
    """Lane-axis tiling: tiles are multiples of 128.  Prefer >= 2 grid steps so
    both v7x TensorCores get work, while making tiles big enough to amortize the
    ~0.35 us per-grid-step pipeline overhead."""
    lanes = 128
    n_blocks = max(1, -(-n // lanes))
    tile_blocks = max(1, min(max_tile_n // lanes, -(-n_blocks // 2)))
    tile_n = tile_blocks * lanes
    n_pad = -(-n // tile_n) * tile_n
    return tile_n, n_pad


def _rnn_step_pallas(x_t, kp, h_prev, *, max_tile_n=2048):
    """x_t: (input_size, N) transposed layout; h_prev: (H, N) or None.
    Returns (out_t: (out_size, N), h_new: (H, N))."""
    input_size, n = x_t.shape
    H = kp["w_hh"].shape[1]
    out_size = kp["w_agg"].shape[1]

    tile_n, n_pad = _pick_tiling(n, max_tile_n)
    if n_pad != n:
        x_t = jnp.pad(x_t, ((0, 0), (0, n_pad - n)))
        if h_prev is not None:
            h_prev = jnp.pad(h_prev, ((0, 0), (0, n_pad - n)))

    grid = (n_pad // tile_n,)
    out_shape = (jax.ShapeDtypeStruct((out_size, n_pad), jnp.float32),
                 jax.ShapeDtypeStruct((H, n_pad), jnp.float32))
    out_specs = (pl.BlockSpec((out_size, tile_n), lambda i: (0, i)),
                 pl.BlockSpec((H, tile_n), lambda i: (0, i)))

    def full(shape):
        return pl.BlockSpec(shape, lambda i: (0, 0))   # resident across grid steps

    cparams = pltpu.CompilerParams(
        dimension_semantics=("parallel",),
        vmem_limit_bytes=_VMEM_LIMIT,
    )

    if h_prev is None:
        out_t, h_new = pl.pallas_call(
            gru_step0_kernel,
            out_shape=out_shape,
            grid_spec=pltpu.PrefetchScalarGridSpec(
                num_scalar_prefetch=0,
                grid=grid,
                in_specs=[
                    pl.BlockSpec((input_size, tile_n), lambda i: (0, i)),   # x tile
                    full((3 * H, input_size)),                              # W_ih
                    full((3 * H, 1)),                                       # folded biases
                    full((H, 1)),                                           # b_hn
                    full((H, out_size)),                                    # W_agg^T
                    full((out_size, 1)),                                    # b_agg
                ],
                out_specs=out_specs,
            ),
            compiler_params=cparams,
        )(x_t, kp["w_ih"], kp["b_g"], kp["b_hn"], kp["w_agg"], kp["b_agg"])
    else:
        out_t, h_new = pl.pallas_call(
            gru_step_kernel,
            out_shape=out_shape,
            grid_spec=pltpu.PrefetchScalarGridSpec(
                num_scalar_prefetch=0,
                grid=grid,
                in_specs=[
                    pl.BlockSpec((input_size, tile_n), lambda i: (0, i)),   # x tile
                    pl.BlockSpec((H, tile_n), lambda i: (0, i)),            # h tile
                    full((3 * H, input_size)),                              # W_ih
                    full((3 * H, H)),                                       # W_hh
                    full((3 * H, 1)),                                       # folded biases
                    full((H, 1)),                                           # b_hn
                    full((H, out_size)),                                    # W_agg^T
                    full((out_size, 1)),                                    # b_agg
                ],
                out_specs=out_specs,
            ),
            compiler_params=cparams,
        )(x_t, h_prev, kp["w_ih"], kp["w_hh"], kp["b_g"], kp["b_hn"],
          kp["w_agg"], kp["b_agg"])

    if n_pad != n:
        out_t = out_t[:, :n]
        h_new = h_new[:, :n]
    return out_t, h_new


def rnn_raymarcher_forward(x_nd, kernel_params, h_prev=None, *, max_tile_n=2048):
    """One RNNRaymarcher forward step (distribution=None path).

    x_nd    : (*dims, input_size)
    h_prev  : (H, N) hidden state from the previous step, or None (storage is None)
    Returns : (out: (*dims, output_size), h_new: (H, N))  -- thread h_new back as h_prev.
    """
    *dims, input_size = x_nd.shape
    n = math.prod(dims)
    x_t = x_nd.reshape(n, input_size).T                     # batch on the 128-lane axis
    out_t, h_new = _rnn_step_pallas(x_t, kernel_params, h_prev, max_tile_n=max_tile_n)
    out = out_t.T.reshape(*dims, out_t.shape[0])
    return out, h_new


def rnn_raymarcher_rollout(xs_nd, kernel_params, *, max_tile_n=2048):
    """Fused T-step raymarch, equivalent to T successive forward() calls starting
    from storage=None.  Use when per-step ray features are precomputable.

    xs_nd   : (T, *dims, input_size)
    Returns : (out: (T, *dims, output_size), h_final: (H, N))
    """
    T, *dims, input_size = xs_nd.shape
    n = math.prod(dims)
    xs_t = jnp.transpose(xs_nd.reshape(T, n, input_size), (0, 2, 1))   # (T, in, N)

    kp = kernel_params
    H = kp["w_hh"].shape[1]
    out_size = kp["w_agg"].shape[1]

    tile_n, n_pad = _pick_tiling(n, max_tile_n)
    if n_pad != n:
        xs_t = jnp.pad(xs_t, ((0, 0), (0, 0), (0, n_pad - n)))

    grid = (n_pad // tile_n, T)   # T innermost -> hidden state stays resident in VMEM

    def full(shape):
        return pl.BlockSpec(shape, lambda i, t: (0, 0))

    out_t, h_fin = pl.pallas_call(
        gru_rollout_kernel,
        out_shape=(jax.ShapeDtypeStruct((T, out_size, n_pad), jnp.float32),
                   jax.ShapeDtypeStruct((H, n_pad), jnp.float32)),
        grid_spec=pltpu.PrefetchScalarGridSpec(
            num_scalar_prefetch=0,
            grid=grid,
            in_specs=[
                pl.BlockSpec((None, input_size, tile_n), lambda i, t: (t, 0, i)),  # x_t tile
                full((3 * H, input_size)),                                         # W_ih
                full((3 * H, H)),                                                  # W_hh
                full((3 * H, 1)),                                                  # folded biases
                full((H, 1)),                                                      # b_hn
                full((H, out_size)),                                               # W_agg^T
                full((out_size, 1)),                                               # b_agg
            ],
            out_specs=(
                pl.BlockSpec((None, out_size, tile_n), lambda i, t: (t, 0, i)),
                pl.BlockSpec((H, tile_n), lambda i, t: (0, i)),
            ),
            scratch_shapes=[pltpu.VMEM((H, tile_n), jnp.float32)],
        ),
        compiler_params=pltpu.CompilerParams(
            dimension_semantics=("parallel", "arbitrary"),
            vmem_limit_bytes=_VMEM_LIMIT,
        ),
    )(xs_t, kp["w_ih"], kp["w_hh"], kp["b_g"], kp["b_hn"], kp["w_agg"], kp["b_agg"])

    if n_pad != n:
        out_t = out_t[:, :, :n]
        h_fin = h_fin[:, :n]
    out = jnp.transpose(out_t, (0, 2, 1)).reshape(T, *dims, out_size)
    return out, h_fin


# ---------------------------------------------------------------------------
# params + pure-JAX reference (PyTorch GRUCell math)
# ---------------------------------------------------------------------------

def init_params(key, input_size, hidden_size, output_size):
    """Deterministic synthetic init, PyTorch layouts:
    weight_ih (3H, in), weight_hh (3H, H), bias_* (3H,) == 1.0,
    aggregator Linear weight (out, H) xavier-normal-like, bias (out,)."""
    k1, k2, k3, k4 = jax.random.split(key, 4)
    # TODO(synk): true orthogonal init (QR) omitted; deterministic scaled-normal stand-in.
    w_ih = jax.random.normal(k1, (3 * hidden_size, input_size), jnp.float32) / math.sqrt(input_size)
    w_hh = jax.random.normal(k2, (3 * hidden_size, hidden_size), jnp.float32) / math.sqrt(hidden_size)
    b_ih = jnp.ones((3 * hidden_size,), jnp.float32)
    b_hh = jnp.ones((3 * hidden_size,), jnp.float32)
    xav = math.sqrt(2.0 / (hidden_size + output_size))
    w_agg = jax.random.normal(k3, (output_size, hidden_size), jnp.float32) * xav
    b_agg = jax.random.normal(k4, (output_size,), jnp.float32) * 0.1
    return dict(w_ih=w_ih, w_hh=w_hh, b_ih=b_ih, b_hh=b_hh, w_agg=w_agg, b_agg=b_agg)


def prepare_kernel_params(p):
    """Kernel-side layouts: weights untransposed (lhs of W @ x), r/z cell biases
    folded (b_ih + b_hh).  The n-gate biases stay separate because
    n = tanh(i_n + b_in + r * (h_n + b_hn))."""
    H = p["w_hh"].shape[1]
    b_g = jnp.concatenate([p["b_ih"][:2 * H] + p["b_hh"][:2 * H], p["b_ih"][2 * H:]])
    return dict(
        w_ih=p["w_ih"],                 # (3H, in)
        w_hh=p["w_hh"],                 # (3H, H)
        b_g=b_g[:, None],               # (3H, 1)
        b_hn=p["b_hh"][2 * H:, None],   # (H, 1)
        w_agg=p["w_agg"].T,             # (H, out)
        b_agg=p["b_agg"][:, None],      # (out, 1)
    )


def rnn_raymarcher_reference(x, h0, p):
    """Pure-JAX reference mirroring PyTorch GRUCell + Linear + Softplus."""
    H = p["w_hh"].shape[1]
    if h0 is None:
        h0 = jnp.zeros((x.shape[0], H), x.dtype)
    gi = x @ p["w_ih"].T + p["b_ih"]
    gh = h0 @ p["w_hh"].T + p["b_hh"]
    i_r, i_z, i_n = gi[:, :H], gi[:, H:2 * H], gi[:, 2 * H:]
    h_r, h_z, h_n = gh[:, :H], gh[:, H:2 * H], gh[:, 2 * H:]
    r = jax.nn.sigmoid(i_r + h_r)
    z = jax.nn.sigmoid(i_z + h_z)
    n = jnp.tanh(i_n + r * h_n)
    h_new = (1.0 - z) * n + z * h0
    agg = h_new @ p["w_agg"].T + p["b_agg"]
    return jax.nn.softplus(agg), h_new


# ---------------------------------------------------------------------------
# demo / correctness check
# ---------------------------------------------------------------------------

if __name__ == "__main__":
    input_size, hidden_size, output_size = 4, 32, 1
    dims = (2, 16, 16)                               # D1 x D2 x D3 leading dims -> N = 512
    T = 8                                            # raymarch steps for the fused rollout

    key = jax.random.PRNGKey(0)
    kx0, kx1, kxs, kp = jax.random.split(key, 4)
    params = init_params(kp, input_size, hidden_size, output_size)
    kparams = prepare_kernel_params(params)

    x0 = jax.random.normal(kx0, dims + (input_size,), jnp.float32)
    x1 = jax.random.normal(kx1, dims + (input_size,), jnp.float32)
    xs = jax.random.normal(kxs, (T,) + dims + (input_size,), jnp.float32)

    # --- step-by-step path (matches module forward + mutable self.storage) ---
    out0, h1 = rnn_raymarcher_forward(x0, kparams, h_prev=None)   # storage is None
    out1, h2 = rnn_raymarcher_forward(x1, kparams, h_prev=h1)     # recurrence
    out1 = jax.block_until_ready(out1)

    xf0 = x0.reshape(-1, input_size)
    xf1 = x1.reshape(-1, input_size)
    ref_out0, ref_h1 = rnn_raymarcher_reference(xf0, None, params)
    ref_out1, ref_h2 = rnn_raymarcher_reference(xf1, ref_h1, params)

    assert out0.shape == dims + (output_size,)
    assert out1.shape == dims + (output_size,)
    ok = bool(jnp.allclose(out0, ref_out0.reshape(*dims, output_size), atol=2e-4, rtol=2e-4))
    ok &= bool(jnp.allclose(out1, ref_out1.reshape(*dims, output_size), atol=2e-4, rtol=2e-4))
    ok &= bool(jnp.allclose(h2.T, ref_h2, atol=2e-4, rtol=2e-4))
    assert ok, "step kernel mismatch vs reference"

    # --- fused rollout path (hidden state resident in VMEM across T steps) ---
    outs, h_fin = rnn_raymarcher_rollout(xs, kparams)
    outs = jax.block_until_ready(outs)
    assert outs.shape == (T,) + dims + (output_size,)

    ref_h = None
    ok2 = True
    for t in range(T):
        ref_out_t, ref_h = rnn_raymarcher_reference(xs[t].reshape(-1, input_size), ref_h, params)
        ok2 &= bool(jnp.allclose(outs[t], ref_out_t.reshape(*dims, output_size),
                                 atol=2e-4, rtol=2e-4))
    ok2 &= bool(jnp.allclose(h_fin.T, ref_h, atol=2e-4, rtol=2e-4))
    assert ok2, "rollout kernel mismatch vs reference"

    print("KERNEL_OK")
</pallas_src>

<mosaic_0001>
module attributes {stable_mosaic.version = 11 : i64} {
  func.func @gru_step0_kernel(%arg0: i32, %arg1: memref<4x256xf32, #tpu.memory_space<vmem>>, %arg2: memref<96x4xf32, #tpu.memory_space<vmem>>, %arg3: memref<96x1xf32, #tpu.memory_space<vmem>>, %arg4: memref<32x1xf32, #tpu.memory_space<vmem>>, %arg5: memref<32x1xf32, #tpu.memory_space<vmem>>, %arg6: memref<1x1xf32, #tpu.memory_space<vmem>>, %arg7: memref<1x256xf32, #tpu.memory_space<vmem>>, %arg8: memref<32x256xf32, #tpu.memory_space<vmem>>) attributes {dimension_semantics = [#tpu.dimension_semantics<parallel>], iteration_bounds = array<i64: 2>, scalar_prefetch = 0 : i64, scratch_operands = 0 : i64, tpu.core_type = #tpu.core_type<tc>, window_params = [{transform_indices = @transform_0, window_bounds = array<i64: 4, 256>}, {pipeline_mode = #tpu.pipeline_mode<synchronous>, transform_indices = @transform_1, window_bounds = array<i64: 96, 4>}, {pipeline_mode = #tpu.pipeline_mode<synchronous>, transform_indices = @transform_2, window_bounds = array<i64: 96, 1>}, {pipeline_mode = #tpu.pipeline_mode<synchronous>, transform_indices = @transform_3, window_bounds = array<i64: 32, 1>}, {pipeline_mode = #tpu.pipeline_mode<synchronous>, transform_indices = @transform_4, window_bounds = array<i64: 32, 1>}, {pipeline_mode = #tpu.pipeline_mode<synchronous>, transform_indices = @transform_5, window_bounds = array<i64: 1, 1>}, {transform_indices = @transform_6, window_bounds = array<i64: 1, 256>}, {transform_indices = @transform_7, window_bounds = array<i64: 32, 256>}]} {
    %c0 = arith.constant 0 : index
    %c0_0 = arith.constant 0 : index
    %0 = vector.load %arg1[%c0, %c0_0] : memref<4x256xf32, #tpu.memory_space<vmem>>, vector<4x256xf32>
    %c0_1 = arith.constant 0 : index
    %c0_2 = arith.constant 0 : index
    %1 = vector.load %arg2[%c0_1, %c0_2] : memref<96x4xf32, #tpu.memory_space<vmem>>, vector<96x4xf32>
    %c0_3 = arith.constant 0 : index
    %c0_4 = arith.constant 0 : index
    %2 = vector.load %arg3[%c0_3, %c0_4] : memref<96x1xf32, #tpu.memory_space<vmem>>, vector<96x1xf32>
    %3 = vector.extract_strided_slice %1 {offsets = [0, 0], sizes = [96, 1], strides = [1, 1]} : vector<96x4xf32> to vector<96x1xf32>
    %4 = vector.extract_strided_slice %0 {offsets = [0, 0], sizes = [1, 256], strides = [1, 1]} : vector<4x256xf32> to vector<1x256xf32>
    %5 = vector.broadcast %3 : vector<96x1xf32> to vector<96x256xf32>
    %6 = vector.broadcast %4 : vector<1x256xf32> to vector<96x256xf32>
    %7 = arith.mulf %5, %6 : vector<96x256xf32>
    %8 = vector.extract_strided_slice %1 {offsets = [0, 1], sizes = [96, 1], strides = [1, 1]} : vector<96x4xf32> to vector<96x1xf32>
    %9 = vector.extract_strided_slice %0 {offsets = [1, 0], sizes = [1, 256], strides = [1, 1]} : vector<4x256xf32> to vector<1x256xf32>
    %10 = vector.broadcast %8 : vector<96x1xf32> to vector<96x256xf32>
    %11 = vector.broadcast %9 : vector<1x256xf32> to vector<96x256xf32>
    %12 = arith.mulf %10, %11 : vector<96x256xf32>
    %13 = arith.addf %7, %12 : vector<96x256xf32>
    %14 = vector.extract_strided_slice %1 {offsets = [0, 2], sizes = [96, 1], strides = [1, 1]} : vector<96x4xf32> to vector<96x1xf32>
    %15 = vector.extract_strided_slice %0 {offsets = [2, 0], sizes = [1, 256], strides = [1, 1]} : vector<4x256xf32> to vector<1x256xf32>
    %16 = vector.broadcast %14 : vector<96x1xf32> to vector<96x256xf32>
    %17 = vector.broadcast %15 : vector<1x256xf32> to vector<96x256xf32>
    %18 = arith.mulf %16, %17 : vector<96x256xf32>
    %19 = arith.addf %13, %18 : vector<96x256xf32>
    %20 = vector.extract_strided_slice %1 {offsets = [0, 3], sizes = [96, 1], strides = [1, 1]} : vector<96x4xf32> to vector<96x1xf32>
    %21 = vector.extract_strided_slice %0 {offsets = [3, 0], sizes = [1, 256], strides = [1, 1]} : vector<4x256xf32> to vector<1x256xf32>
    %22 = vector.broadcast %20 : vector<96x1xf32> to vector<96x256xf32>
    %23 = vector.broadcast %21 : vector<1x256xf32> to vector<96x256xf32>
    %24 = arith.mulf %22, %23 : vector<96x256xf32>
    %25 = arith.addf %19, %24 : vector<96x256xf32>
    %26 = vector.broadcast %2 : vector<96x1xf32> to vector<96x256xf32>
    %27 = arith.addf %25, %26 : vector<96x256xf32>
    %c0_5 = arith.constant 0 : index
    %c0_6 = arith.constant 0 : index
    %28 = vector.load %arg4[%c0_5, %c0_6] : memref<32x1xf32, #tpu.memory_space<vmem>>, vector<32x1xf32>
    %29 = vector.extract_strided_slice %27 {offsets = [0, 0], sizes = [32, 256], strides = [1, 1]} : vector<96x256xf32> to vector<32x256xf32>
    %30 = arith.negf %29 : vector<32x256xf32>
    %31 = math.exp %30 : vector<32x256xf32>
    %cst = arith.constant 1.000000e+00 : f32
    %32 = vector.broadcast %cst : f32 to vector<32x256xf32>
    %33 = arith.addf %32, %31 : vector<32x256xf32>
    %34 = arith.divf %32, %33 : vector<32x256xf32>
    %35 = vector.extract_strided_slice %27 {offsets = [32, 0], sizes = [32, 256], strides = [1, 1]} : vector<96x256xf32> to vector<32x256xf32>
    %36 = arith.negf %35 : vector<32x256xf32>
    %37 = math.exp %36 : vector<32x256xf32>
    %cst_7 = arith.constant 1.000000e+00 : f32
    %38 = vector.broadcast %cst_7 : f32 to vector<32x256xf32>
    %39 = arith.addf %38, %37 : vector<32x256xf32>
    %40 = arith.divf %38, %39 : vector<32x256xf32>
    %41 = vector.extract_strided_slice %27 {offsets = [64, 0], sizes = [32, 256], strides = [1, 1]} : vector<96x256xf32> to vector<32x256xf32>
    %42 = vector.broadcast %28 : vector<32x1xf32> to vector<32x256xf32>
    %43 = arith.mulf %34, %42 : vector<32x256xf32>
    %44 = arith.addf %41, %43 : vector<32x256xf32>
    %45 = math.tanh %44 : vector<32x256xf32>
    %cst_8 = arith.constant 1.000000e+00 : f32
    %46 = vector.broadcast %cst_8 : f32 to vector<32x256xf32>
    %47 = arith.subf %46, %40 : vector<32x256xf32>
    %48 = arith.mulf %47, %45 : vector<32x256xf32>
    %c0_9 = arith.constant 0 : index
    %c0_10 = arith.constant 0 : index
    %49 = vector.load %arg8[%c0_9, %c0_10] : memref<32x256xf32, #tpu.memory_space<vmem>>, vector<32x256xf32>
    tpu.vector_store %arg8[%c0_9, %c0_10], %48 {strides = array<i32>} : memref<32x256xf32, #tpu.memory_space<vmem>>, vector<32x256xf32>,
    %c0_11 = arith.constant 0 : index
    %c0_12 = arith.constant 0 : index
    %50 = vector.load %arg5[%c0_11, %c0_12] : memref<32x1xf32, #tpu.memory_space<vmem>>, vector<32x1xf32>
    %c0_13 = arith.constant 0 : index
    %c0_14 = arith.constant 0 : index
    %51 = vector.load %arg6[%c0_13, %c0_14] : memref<1x1xf32, #tpu.memory_space<vmem>>, vector<1x1xf32>
    %52 = vector.broadcast %50 : vector<32x1xf32> to vector<32x256xf32>
    %53 = arith.mulf %52, %48 : vector<32x256xf32>
    %cst_15 = arith.constant dense<0.000000e+00> : vector<256xf32>
    %54 = vector.multi_reduction <add>, %53, %cst_15 [0] : vector<32x256xf32> to vector<256xf32>
    %55 = vector.shape_cast %54 : vector<256xf32> to vector<1x256xf32>
    %56 = vector.broadcast %51 : vector<1x1xf32> to vector<1x256xf32>
    %57 = arith.addf %55, %56 : vector<1x256xf32>
    %cst_16 = arith.constant 0.000000e+00 : f32
    %58 = vector.broadcast %cst_16 : f32 to vector<1x256xf32>
    %59 = arith.maximumf %57, %58 : vector<1x256xf32>
    %60 = vector.broadcast %cst_16 : f32 to vector<1x256xf32>
    %61 = arith.subf %57, %60 : vector<1x256xf32>
    %62 = arith.cmpf one, %61, %61 : vector<1x256xf32>
    %63 = vector.broadcast %cst_16 : f32 to vector<1x256xf32>
    %64 = arith.addf %57, %63 : vector<1x256xf32>
    %65 = math.absf %61 : vector<1x256xf32>
    %cst_17 = arith.constant 0.000000e+00 : f32
    %66 = vector.broadcast %cst_17 : f32 to vector<1x256xf32>
    %67 = arith.subf %66, %65 : vector<1x256xf32>
    %68 = math.exp %67 : vector<1x256xf32>
    %69 = math.log1p %68 : vector<1x256xf32>
    %70 = arith.addf %59, %69 : vector<1x256xf32>
    %71 = arith.select %62, %64, %70 : vector<1x256xi1>, vector<1x256xf32>
    %c0_18 = arith.constant 0 : index
    %c0_19 = arith.constant 0 : index
    %72 = vector.load %arg7[%c0_18, %c0_19] : memref<1x256xf32, #tpu.memory_space<vmem>>, vector<1x256xf32>
    tpu.vector_store %arg7[%c0_18, %c0_19], %71 {strides = array<i32>} : memref<1x256xf32, #tpu.memory_space<vmem>>, vector<1x256xf32>,
    return
  }
  func.func @transform_0(%arg0: i32) -> (i32, i32) {
    %c0_i32 = arith.constant 0 : i32
    %c0_i32_0 = arith.constant 0 : i32
    return %c0_i32, %arg0 : i32, i32
  }
  func.func @transform_1(%arg0: i32) -> (i32, i32) {
    %c0_i32 = arith.constant 0 : i32
    %c0_i32_0 = arith.constant 0 : i32
    %c0_i32_1 = arith.constant 0 : i32
    return %c0_i32, %c0_i32_0 : i32, i32
  }
  func.func @transform_2(%arg0: i32) -> (i32, i32) {
    %c0_i32 = arith.constant 0 : i32
    %c0_i32_0 = arith.constant 0 : i32
    %c0_i32_1 = arith.constant 0 : i32
    return %c0_i32, %c0_i32_0 : i32, i32
  }
  func.func @transform_3(%arg0: i32) -> (i32, i32) {
    %c0_i32 = arith.constant 0 : i32
    %c0_i32_0 = arith.constant 0 : i32
    %c0_i32_1 = arith.constant 0 : i32
    return %c0_i32, %c0_i32_0 : i32, i32
  }
  func.func @transform_4(%arg0: i32) -> (i32, i32) {
    %c0_i32 = arith.constant 0 : i32
    %c0_i32_0 = arith.constant 0 : i32
    %c0_i32_1 = arith.constant 0 : i32
    return %c0_i32, %c0_i32_0 : i32, i32
  }
  func.func @transform_5(%arg0: i32) -> (i32, i32) {
    %c0_i32 = arith.constant 0 : i32
    %c0_i32_0 = arith.constant 0 : i32
    %c0_i32_1 = arith.constant 0 : i32
    return %c0_i32, %c0_i32_0 : i32, i32
  }
  func.func @transform_6(%arg0: i32) -> (i32, i32) {
    %c0_i32 = arith.constant 0 : i32
    %c0_i32_0 = arith.constant 0 : i32
    return %c0_i32, %arg0 : i32, i32
  }
  func.func @transform_7(%arg0: i32) -> (i32, i32) {
    %c0_i32 = arith.constant 0 : i32
    %c0_i32_0 = arith.constant 0 : i32
    return %c0_i32, %arg0 : i32, i32
  }
}

</mosaic_0001>

<bundles_post_ra>
// kernel: tpu_custom_call.1
= control target key start
LH: loop header
LB: loop body
LE: loop exit
PB: predicated region body
PF: predicated region fallthrough
CT: control target
= control target key end

     0   :  { %s2201_s0 = inlined_call_operand.vmem [shape: f32[4,512], index: 0, kind: input, shape index: {}]   ;;  %s2202_s1 = inlined_call_operand.vmem [shape: f32[96,4], index: 1, kind: input, shape index: {}]   ;;  %s2203_s2 = inlined_call_operand.vmem [shape: f32[96,1], index: 2, kind: input, shape index: {}]   ;;  %s2204_s3 = inlined_call_operand.vmem [shape: f32[32,1], index: 3, kind: input, shape index: {}]   ;;  %s2205_s4 = inlined_call_operand.vmem [shape: f32[32,1], index: 4, kind: input, shape index: {}]   ;;  %s2206_s5 = inlined_call_operand.<no memory space> [shape: f32[1,1], index: 5, kind: input, shape index: {}]   ;;  %s2207_s6 = inlined_call_operand.hbm [shape: f32[1,512], index: 6, kind: output, shape index: {0}]   ;;  %s2208_s7 = inlined_call_operand.hbm [shape: f32[32,512], index: 7, kind: output, shape index: {1}]  }
   0x1   :  { %v13_v0 = vstv %s2206_s5 }
   0x2   :  { %14 = vst [vmem:[#allocation2] sm:$0x1] %v13_v0 }
   0x3   :  { %15 = vsyncpa [#allocation4], 0 }
   0x4   :  { %17 = vsyncpa [#allocation4 + $0x1], 0 }
   0x5   :  { %18 = vsyncpa [#allocation6], 0 }
   0x6   :  { %20 = vsyncpa [#allocation6 + $0x1], 0  ;;  %s1609_s26 = smov 0   ;;  %s1611_s27 = smov 0  }
   0x7   :  { %s1613_s28 = smov 0   ;;  %s1615_s29 = smov 0  }
   0x8 LB: > { %s1630_s5 = sadd.s32 4294967295, %s1554_s29   ;;  %s1264_s30 = sadd.s32 4294967294, %s1554_s29   ;;  %s1554_s29 = sphi %s1615_s29, %s2229_s29   ;;  %s1550_s28 = sphi %s1613_s28, %s2228_s28   ;;  %s1546_s27 = sphi %s1611_s27, %s2227_s27   ;;  %s1542_s26 = sphi %s1609_s26, %s2226_s26  }
   0x9   : > { %s1634_s8 = sadd.s32 1, %s1554_s29   ;;  %s164_s9 = sadd.s32 1, %s1550_s28 }
   0xa   : > { %s161_s10 = ssub.s32 %s1554_s29, %s1634_s8  ;;  %p174_p0 = scmp.ne.s32.totalorder %s1550_s28, %s1546_s27 }
   0xb   : > { %p162_p1 = scmp.eq.s32.totalorder %s161_s10, 0  ;;  %p175_p2 = scmp.eq.s32.totalorder %s1630_s5, 1 }
   0xc   : > { %p180_p3 = scmp.ne.s32.totalorder %s1546_s27, %s1542_s26  ;;  %p181_p4 = scmp.eq.s32.totalorder %s1264_s30, 1 }
   0xd   : > { %s1645_s11 = scalar_select %p162_p1, %s1550_s28, %s164_s9  }
   0xe   : > { %p1647_p5 = por %p175_p2, %p174_p0  ;;  %p1651_p6 = por %p181_p4, %p180_p3 }
   0xf   : > { %p1267_p7 = scmp.ge.s32.totalorder %s1554_s29, 1  ;;  %p249_p8 = scmp.lt.s32.totalorder %s1554_s29, 3 }
  0x11   : > { %p250_p9 = pnand %p1267_p7, %p249_p8 }
  0x13   : > { %253 = sbr.rel (%p250_p9) target bundleno = 424 (0x1a8), region = 44 }
  0x18   : > { %v297_v1 = vld [vmem:[%s2202_s1 + $0x10] sm:$0xff]  ;;  %v295_v2 = vld [vmem:[%s2202_s1] sm:$0xff]  ;;  %v1556_v3 = vmov 3   ;;  %v1557_v4 = vmov 0   ;;  %v298_v5 = vld [vmem:[%s2202_s1 + $0x18] sm:$0xff]  ;;  %v1558_v14 = vmov 1   ;;  %v2209_v37 = vlaneseq }
  0x19   : > { %1353 = vset.pattern.permute.xlu0 %v1556_v3  ;;  %1350 = vset.pattern.permute.xlu1 %v1557_v4  ;;  %v300_v6 = vld [vmem:[%s2202_s1 + $0x28] sm:$0xff]  ;;  %v1675_v7 = vld [vmem:[%s2202_s1 + $0x38] sm:$0xff]  ;;  %v299_v10 = vld [vmem:[%s2202_s1 + $0x20] sm:$0xff]  ;;  %v1559_v19 = vmov 2   ;;  %s1270_s21 = sshll.u32 %s1630_s5, 1  ;;  %s2118_s23 = sand.u32 1, %s1546_s27  }
  0x1a   : > { %331 = vperm.xlu1 %1350, %v297_v1   ;;  %651 = vperm.xlu0 %1353, %v295_v2   ;;  %v296_v8 = vld [vmem:[%s2202_s1 + $0x8] sm:$0xff]  ;;  %v1693_v11 = vld [vmem:[%s2202_s1 + $0x58] sm:$0xff]  ;;  %v301_v12 = vld [vmem:[%s2202_s1 + $0x30] sm:$0xff]  ;;  %p287_p10 = scmp.lt.s32.totalorder %s1270_s21, 3  ;;  %v1802_v40 = vshrl.u32 %v2209_v37, 7  ;;  %s1269_s24 = sshll.u32 %s2118_s23, 6 }
  0x1b   : > { %v1684_v9 = vld [vmem:[%s2202_s1 + $0x48] sm:$0xff]  ;;  %v1702_v13 = vld [vmem:[%s2202_s1 + $0x40] sm:$0xff]  ;;  %v1709_v15 = vld [vmem:[%s2202_s1 + $0x50] sm:$0xff]  ;;  %s1297_s9 = sshll.u32 %s1630_s5, 8  ;;  %s1143_s16 = scalar_lea.sflag [#allocation6], %s2118_s23 }
  0x1c   : > { %v307_v16 = vld [vmem:[%s2203_s2] sm:$0xff]  ;;  %v310_v17 = vld [vmem:[%s2203_s2 + $0x18] sm:$0xff]  ;;  %v312_v18 = vld [vmem:[%s2203_s2 + $0x28] sm:$0xff]  ;;  %s2231_s21 = smov (!%p287_p10, %s1270_s21), 3  ;;  %2215 = vst [vmem:[#allocation9_spill] sm:$0xff] %v1802_v40  ;;  %v1811_v42 = vsub.s32 0, %v1802_v40  ;;  %s2136_s15 = scalar_lea.hbm %s2208_s7, %s1297_s9 }
  0x1d   : > { %v308_v20 = vld [vmem:[%s2203_s2 + $0x8] sm:$0xff]  ;;  %v309_v21 = vld [vmem:[%s2203_s2 + $0x10] sm:$0xff]  ;;  %v315_v22 = vld [vmem:[%s2203_s2 + $0x40] sm:$0xff]  ;;  %s1271_s22 = sshll.u32 %s2231_s21, 2  ;;  %v386_v43 = vsub.s32 4, %v1802_v40  ;;  %v472_v47 = vsub.s32 1, %v1802_v40 }
  0x1e   : > { %336 = vperm.xlu1 %1350, %v298_v5   ;;  %659 = vperm.xlu0 %1353, %v297_v1   ;;  %v849_v23 = vld [vmem:[%s2204_s3 + $0x8] sm:$0xff]  ;;  %v311_v24 = vld [vmem:[%s2203_s2 + $0x20] sm:$0xff]  ;;  %v850_v25 = vld [vmem:[%s2204_s3 + $0x10] sm:$0xff]  ;;  %s290_s25 = scalar_lea.vmem %s2201_s0, %s1271_s22  ;;  %2216 = vst [vmem:[#allocation10_spill] sm:$0xff] %v1811_v42  ;;  %v476_v48 = vsub.s32 5, %v1802_v40  ;;  %s1560_s18 = smov [#allocation5]  }
  0x1f   : > { %v313_v26 = vld [vmem:[%s2203_s2 + $0x30] sm:$0xff]  ;;  %v851_v27 = vld [vmem:[%s2204_s3 + $0x18] sm:$0xff]  ;;  %v1017_v29 = vld [vmem:[%s2205_s4 + $0x8] sm:$0xff]  ;;  %s1468_s19 = sshll.u32 %s1560_s18, 4  ;;  %s1469_s19 = int_to_ptr.vmem [resolvable:$false] %s1468_s19 }
  0x20   : > { %v314_v28 = vld [vmem:[%s2203_s2 + $0x38] sm:$0xff]  ;;  %v294_v45 = vld [vmem:[%s290_s25] sm:$0xff]  ;;  %v316_v55 = vld [vmem:[%s2203_s2 + $0x48] sm:$0xff]  ;;  %s2121_s25 = scalar_lea.vmem [#allocation5], %s1269_s24  ;;  %s1470_s20 = scalar_lea.vmem %s1469_s19, 2048 }
  0x21   : > { %v1019_v30 = vld [vmem:[%s2205_s4 + $0x18] sm:$0xff]  ;;  %v383_v49 = vrot.slane %v294_v45, %v1811_v42  ;;  %v387_v50 = vrot.slane %v294_v45, %v386_v43  ;;  %v473_v52 = vrot.slane %v294_v45, %v472_v47  ;;  %v477_v53 = vrot.slane %v294_v45, %v476_v48  ;;  %v848_v61 = vld [vmem:[%s2204_s3] sm:$0xff]  ;;  %s1170_s30 = sshll.u32 %s2121_s25, 4  ;;  %s2130_s30 = int_to_ptr.vmem [resolvable:$true] %s1170_s30 }
  0x22   : > { %346 = vperm.xlu1 %1350, %v300_v6   ;;  %1356 = vset.pattern.permute.xlu0 %v1557_v4  ;;  %v1020_v48 = vld [vmem:[#allocation2] sm:$0x1]  ;;  %s1464_s17 = scalar_lea.vmem %s2130_s30, 1024  ;;  %p1471_p0 = scmp.lt.s32.totalorder %s2130_s30, %s1469_s19 }
  0x23   : > { %321 = vperm.xlu0 %1356, %v295_v2   ;;  %v1832_v56 = vrot.slane %v383_v49, %v1811_v42  ;;  %v1835_v57 = vrot.slane %v387_v50, %v1811_v42  ;;  %v1838_v58 = vrot.slane %v473_v52, %v472_v47  ;;  %v1840_v59 = vrot.slane %v477_v53, %v472_v47  ;;  %p1465_p11 = scmp.ne.s32.totalorder %s2130_s30, %s1464_s17  ;;  %p1472_p1 = scmp.lt.s32.totalorder %s1470_s20, %s1464_s17 }
  0x25   : > { %p1466_p12 = pnand %p1465_p11, %p1647_p5  ;;  %p1473_p2 = por %p1472_p1, %p1471_p0 }
  0x26   : > { %356 = vperm.xlu1 %1350, %v1675_v7  }
  0x27   : > { %326 = vperm.xlu0 %1356, %v296_v8   ;;  %p1467_p13 = pneg %p1466_p12 }
  0x29   : > { %p1474_p3 = pnand %p1473_p2, %p1467_p13 }
  0x2a   : > { %366 = vperm.xlu1 %1350, %v1684_v9  }
  0x2b   : > { %341 = vperm.xlu0 %1356, %v299_v10  }
  0x2e   : > { %376 = vperm.xlu1 %1350, %v1693_v11  }
  0x2f   : > { %351 = vperm.xlu0 %1356, %v301_v12  }
  0x32   : > { %1351 = vset.pattern.permute.xlu1 %v1558_v14 }
  0x33   : > { %427 = vperm.xlu1 %1351, %v296_v8   ;;  %361 = vperm.xlu0 %1356, %v1702_v13  }
  0x37   : > { %431 = vperm.xlu1 %1351, %v297_v1   ;;  %371 = vperm.xlu0 %1356, %v1709_v15  }
  0x3b   : > { %439 = vperm.xlu1 %1351, %v299_v10   ;;  %766 = vperm.xlu0 %1356, %v307_v16   ;;  %v586_v16 = vsub.s32 2, %v1802_v40 }
  0x3f   : > { %447 = vperm.xlu1 %1351, %v301_v12   ;;  %781 = vperm.xlu0 %1356, %v310_v17   ;;  %v590_v17 = vsub.s32 6, %v1802_v40 }
  0x43   : > { %455 = vperm.xlu1 %1351, %v1702_v13   ;;  %791 = vperm.xlu0 %1356, %v312_v18  }
  0x47   : > { %1352 = vset.pattern.permute.xlu1 %v1559_v19  ;;  %1364 = vset.pattern.permute.xlu0 %v1558_v14 }
  0x48   : > { %541 = vperm.xlu1 %1352, %v296_v8   ;;  %423 = vperm.xlu0 %1364, %v295_v2  }
  0x4c   : > { %545 = vperm.xlu1 %1352, %v297_v1   ;;  %435 = vperm.xlu0 %1364, %v298_v5  }
  0x50   : > { %1354 = vset.pattern.permute.xlu1 %v1556_v3  ;;  %443 = vperm.xlu0 %1364, %v300_v6  }
  0x51   : > { %655 = vperm.xlu1 %1354, %v296_v8  }
  0x54   : > { %451 = vperm.xlu0 %1364, %v1675_v7  }
  0x55   : > { %1355 = vset.pattern.permute.xlu1 %v1559_v19 }
  0x56   : > { %549 = vperm.xlu1 %1355, %v298_v5  }
  0x58   : > { %459 = vperm.xlu0 %1364, %v1684_v9  }
  0x5a   : > { %1357 = vset.pattern.permute.xlu1 %v1556_v3 }
  0x5b   : > { %663 = vperm.xlu1 %1357, %v298_v5  }
  0x5c   : > { %1365 = vset.pattern.permute.xlu0 %v1559_v19 }
  0x5d   : > { %537 = vperm.xlu0 %1365, %v295_v2  }
  0x5f   : > { %1358 = vset.pattern.permute.xlu1 %v1557_v4 }
  0x60   : > { %771 = vperm.xlu1 %1358, %v308_v20  }
  0x61   : > { %557 = vperm.xlu0 %1365, %v300_v6  }
  0x64   : > { %776 = vperm.xlu1 %1358, %v309_v21  }
  0x65   : > { %573 = vperm.xlu0 %1365, %v1684_v9  }
  0x68   : > { %1359 = vset.pattern.permute.xlu1 %v1559_v19 }
  0x69   : > { %553 = vperm.xlu1 %1359, %v299_v10   ;;  %1368 = vset.pattern.permute.xlu0 %v1556_v3 }
  0x6a   : > { %671 = vperm.xlu0 %1368, %v300_v6   ;;  %v317_v6 = vld [vmem:[%s2203_s2 + $0x50] sm:$0xff] }
  0x6d   : > { %561 = vperm.xlu1 %1359, %v301_v12  }
  0x6e   : > { %679 = vperm.xlu0 %1368, %v1675_v7  }
  0x71   : > { %1360 = vset.pattern.permute.xlu1 %v1556_v3 }
  0x72   : > { %667 = vperm.xlu1 %1360, %v299_v10   ;;  %683 = vperm.xlu0 %1368, %v1702_v13   ;;  %v700_v10 = vsub.s32 3, %v1802_v40 }
  0x74   : > { %v701_v21 = vrot.slane %v294_v45, %v700_v10 }
  0x76   : > { %1361 = vset.pattern.permute.xlu1 %v1559_v19  ;;  %691 = vperm.xlu0 %1368, %v1709_v15  }
  0x77   : > { %565 = vperm.xlu1 %1361, %v1675_v7  }
  0x7a   : > { %1374 = vset.pattern.permute.xlu0 %v1557_v4 }
  0x7b   : > { %1362 = vset.pattern.permute.xlu1 %v1556_v3  ;;  %806 = vperm.xlu0 %1374, %v315_v22  }
  0x7c   : > { %675 = vperm.xlu1 %1362, %v301_v12  }
  0x7f   : > { %955 = vperm.xlu0 %1374, %v849_v23  }
  0x80   : > { %1363 = vset.pattern.permute.xlu1 %v1557_v4 }
  0x81   : > { %786 = vperm.xlu1 %1363, %v311_v24  }
  0x83   : > { %960 = vperm.xlu0 %1374, %v850_v25   ;;  %v587_v25 = vrot.slane %v294_v45, %v586_v16 }
  0x85   : > { %796 = vperm.xlu1 %1363, %v313_v26   ;;  %v591_v26 = vrot.slane %v294_v45, %v590_v17  ;;  %v1887_v43 = vrot.slane %v587_v25, %v586_v16 }
  0x87   : > { %965 = vperm.xlu0 %1374, %v851_v27   ;;  %v1018_v27 = vld [vmem:[%s2205_s4 + $0x10] sm:$0xff]  ;;  %v1889_v47 = vrot.slane %v591_v26, %v586_v16 }
  0x89   : > { %801 = vperm.xlu1 %1363, %v314_v28  }
  0x8b   : > { %1028 = vperm.xlu0 %1374, %v1017_v29   ;;  %v1881_v29 = vrot.slane %v701_v21, %v700_v10 }
  0x8d   : > { %1366 = vset.pattern.permute.xlu1 %v1558_v14 }
  0x8e   : > { %463 = vperm.xlu1 %1366, %v1709_v15  }
  0x8f   : > { %1038 = vperm.xlu0 %1374, %v1019_v30  }
  0x92   : > { %1367 = vset.pattern.permute.xlu1 %v1559_v19 }
  0x93   : > { %569 = vperm.xlu1 %1367, %v1702_v13  }
  0x95   : > { %v332_v31 = vpop.permute.xlu1 %331  ;;  %v1780_v32 = vpop.permute.xlu0 %651 }
  0x96   : > { %v402_v62 = vmul.f32 %v1832_v56, %v332_v31  ;;  %v403_v63 = vmul.f32 %v1835_v57, %v332_v31 }
  0x97   : > { %1369 = vset.pattern.permute.xlu1 %v1558_v14 }
  0x98   : > { %467 = vperm.xlu1 %1369, %v1693_v11  }
  0x99   : > { %v1785_v33 = vpop.permute.xlu1 %336  ;;  %v1787_v34 = vpop.permute.xlu0 %659 }
  0x9c   : > { %1370 = vset.pattern.permute.xlu1 %v1559_v19 }
  0x9d   : > { %v1790_v35 = vpop.permute.xlu1 %346  ;;  %577 = vperm.xlu1 %1370, %v1709_v15   ;;  %v1016_v15 = vld [vmem:[%s2205_s4] sm:$0xff] }
  0x9e   : > { %v1793_v36 = vpop.permute.xlu0 %321 }
  0xa1   : > { %v1795_v38 = vpop.permute.xlu1 %356  ;;  %1371 = vset.pattern.permute.xlu1 %v1556_v3 }
  0xa2   : > { %687 = vperm.xlu1 %1371, %v1684_v9   ;;  %v1799_v39 = vpop.permute.xlu0 %326  ;;  %v318_v9 = vld [vmem:[%s2203_s2 + $0x58] sm:$0xff] }
  0xa5   : > { %v1807_v41 = vpop.permute.xlu1 %366 }
  0xa6   : > { %1372 = vset.pattern.permute.xlu1 %v1559_v19  ;;  %v1815_v44 = vpop.permute.xlu0 %341 }
  0xa7   : > { %581 = vperm.xlu1 %1372, %v1693_v11  }
  0xa9   : > { %v1817_v46 = vpop.permute.xlu1 %376 }
  0xaa   : > { %v1824_v51 = vpop.permute.xlu0 %351 }
  0xab   : > { %1373 = vset.pattern.permute.xlu1 %v1556_v3 }
  0xac   : > { %695 = vperm.xlu1 %1373, %v1693_v11   ;;  %v704_v11 = vsub.s32 7, %v1802_v40 }
  0xae   : > { %v1826_v54 = vpop.permute.xlu1 %427  ;;  %v362_v0 = vpop.permute.xlu0 %361  ;;  %v705_v22 = vrot.slane %v294_v45, %v704_v11  ;;  %v720_v45 = vmul.f32 %v1881_v29, %v1787_v34 }
  0xaf   : > { %v414_v12 = vmul.f32 %v1832_v56, %v362_v0  ;;  %v415_v13 = vmul.f32 %v1835_v57, %v362_v0  ;;  %v490_v16 = vmul.f32 %v1838_v58, %v1826_v54 }
  0xb0   : > { %1375 = vset.pattern.permute.xlu1 %v1557_v4  ;;  %v1883_v30 = vrot.slane %v705_v22, %v700_v10 }
  0xb1   : > { %811 = vperm.xlu1 %1375, %v316_v55  }
  0xb2   : > { %v432_v60 = vpop.permute.xlu1 %431  ;;  %v1854_v7 = vpop.permute.xlu0 %371  ;;  %v721_v50 = vmul.f32 %v1883_v30, %v1787_v34 }
  0xb3   : > { %v492_v1 = vmul.f32 %v1838_v58, %v432_v60  ;;  %v493_v2 = vmul.f32 %v1840_v59, %v432_v60  ;;  %2217 = vst [vmem:[#allocation11_spill] sm:$0xff] %v1854_v7 }
  0xb5   : > { %v516_v3 = vadd.f32 %v492_v1, %v402_v62  ;;  %v517_v4 = vadd.f32 %v493_v2, %v403_v63  ;;  %950 = vperm.xlu1 %1375, %v848_v61  }
  0xb6   : > { %v1849_v5 = vpop.permute.xlu1 %439  ;;  %v1870_v18 = vpop.permute.xlu0 %766 }
  0xb9   : > { %816 = vperm.xlu1 %1375, %v317_v6  }
  0xba   : > { %v1856_v8 = vpop.permute.xlu1 %447  ;;  %v1885_v31 = vpop.permute.xlu0 %781 }
  0xbd   : > { %821 = vperm.xlu1 %1375, %v318_v9  }
  0xbe   : > { %v456_v14 = vpop.permute.xlu1 %455  ;;  %v1897_v61 = vpop.permute.xlu0 %791 }
  0xbf   : > { %v504_v19 = vmul.f32 %v1838_v58, %v456_v14  ;;  %v505_v20 = vmul.f32 %v1840_v59, %v456_v14 }
  0xc1   : > { %v1874_v23 = vadd.f32 %v504_v19, %v414_v12  ;;  %v1876_v24 = vadd.f32 %v505_v20, %v415_v13  ;;  %1023 = vperm.xlu1 %1375, %v1016_v15   ;;  %v400_v15 = vmul.f32 %v1832_v56, %v1799_v39  ;;  %v401_v19 = vmul.f32 %v1835_v57, %v1799_v39 }
  0xc2   : > { %v491_v20 = vmul.f32 %v1840_v59, %v1826_v54 }
  0xc3   : > { %2218 = vst [vmem:[#allocation12_spill] sm:$0xff] %v1874_v23  ;;  %2219 = vst [vmem:[#allocation13_spill] sm:$0xff] %v1876_v24  ;;  %v542_v28 = vpop.permute.xlu1 %541  ;;  %v424_v1 = vpop.permute.xlu0 %423  ;;  %v514_v25 = vadd.f32 %v490_v16, %v400_v15 }
  0xc4   : > { %v604_v21 = vmul.f32 %v1887_v43, %v542_v28  ;;  %v605_v26 = vmul.f32 %v1889_v47, %v542_v28  ;;  %v488_v39 = vmul.f32 %v1838_v58, %v424_v1  ;;  %v399_v28 = vmul.f32 %v1835_v57, %v1793_v36 }
  0xc5   : > { %1033 = vperm.xlu1 %1375, %v1018_v27   ;;  %v489_v16 = vmul.f32 %v1840_v59, %v424_v1 }
  0xc7   : > { %v546_v49 = vpop.permute.xlu1 %545  ;;  %v436_v9 = vpop.permute.xlu0 %435 }
  0xc8   : > { %v606_v52 = vmul.f32 %v1887_v43, %v546_v49  ;;  %v607_v53 = vmul.f32 %v1889_v47, %v546_v49  ;;  %v494_v49 = vmul.f32 %v1838_v58, %v436_v9 }
  0xc9   : > { %1069 = vperm.xlu1 %1375, %v1020_v48   ;;  %v398_v48 = vmul.f32 %v1832_v56, %v1793_v36 }
  0xca   : > { %v630_v55 = vadd.f32 %v606_v52, %v516_v3  ;;  %v631_v60 = vadd.f32 %v607_v53, %v517_v4  ;;  %v404_v53 = vmul.f32 %v1832_v56, %v1785_v33 }
  0xcb   : > { %v1903_v34 = vpop.permute.xlu0 %443  ;;  %v512_v40 = vadd.f32 %v488_v39, %v398_v48  ;;  %v717_v39 = vmul.f32 %v1883_v30, %v1780_v32 }
  0xcc   : > { %v656_v62 = vpop.permute.xlu1 %655  ;;  %v1899_v63 = vadd.f32 %v720_v45, %v630_v55  ;;  %v1901_v0 = vadd.f32 %v721_v50, %v631_v60  ;;  %v515_v45 = vadd.f32 %v491_v20, %v401_v19  ;;  %v628_v50 = vadd.f32 %v604_v21, %v514_v25 }
  0xcd   : > { %v718_v27 = vmul.f32 %v1881_v29, %v656_v62  ;;  %v719_v54 = vmul.f32 %v1883_v30, %v656_v62  ;;  %v495_v55 = vmul.f32 %v1840_v59, %v436_v9  ;;  %v405_v62 = vmul.f32 %v1835_v57, %v1785_v33 }
  0xce   : > { %v629_v15 = vadd.f32 %v605_v26, %v515_v45  ;;  %v518_v25 = vadd.f32 %v494_v49, %v404_v53 }
  0xcf   : > { %v1907_v12 = vpop.permute.xlu0 %451  ;;  %v742_v20 = vadd.f32 %v718_v27, %v628_v50  ;;  %v519_v45 = vadd.f32 %v495_v55, %v405_v62  ;;  %v513_v27 = vadd.f32 %v489_v16, %v399_v28  ;;  %v407_v55 = vmul.f32 %v1835_v57, %v1815_v44 }
  0xd0   : > { %v743_v42 = vadd.f32 %v719_v54, %v629_v15  ;;  %v499_v15 = vmul.f32 %v1840_v59, %v1903_v34 }
  0xd1   : > { %v550_v2 = vpop.permute.xlu1 %549 }
  0xd2   : > { %v608_v60 = vmul.f32 %v1887_v43, %v550_v2  ;;  %v609_v37 = vmul.f32 %v1889_v47, %v550_v2  ;;  %v716_v2 = vmul.f32 %v1881_v29, %v1780_v32  ;;  %v406_v32 = vmul.f32 %v1832_v56, %v1815_v44 }
  0xd3   : > { %v1913_v13 = vpop.permute.xlu0 %459  ;;  %v496_v44 = vmul.f32 %v1838_v58, %v1849_v5 }
  0xd4   : > { %v632_v1 = vadd.f32 %v608_v60, %v518_v25  ;;  %v633_v33 = vadd.f32 %v609_v37, %v519_v45  ;;  %v1965_v37 = vmul.f32 %v1832_v56, %v1795_v38  ;;  %v497_v25 = vmul.f32 %v1840_v59, %v1849_v5 }
  0xd6   : > { %v664_v6 = vpop.permute.xlu1 %663 }
  0xd7   : > { %v722_v36 = vmul.f32 %v1881_v29, %v664_v6  ;;  %v723_v24 = vmul.f32 %v1883_v30, %v664_v6  ;;  %v408_v6 = vmul.f32 %v1832_v56, %v1790_v35 }
  0xd8   : > { %v538_v17 = vpop.permute.xlu0 %537 }
  0xd9   : > { %v602_v19 = vmul.f32 %v1887_v43, %v538_v17  ;;  %v603_v9 = vmul.f32 %v1889_v47, %v538_v17  ;;  %v746_v49 = vadd.f32 %v722_v36, %v632_v1 }
  0xdb   : > { %v772_v10 = vpop.permute.xlu1 %771  ;;  %v626_v50 = vadd.f32 %v602_v19, %v512_v40  ;;  %v627_v48 = vadd.f32 %v603_v9, %v513_v27  ;;  %v409_v40 = vmul.f32 %v1835_v57, %v1790_v35  ;;  %v498_v35 = vmul.f32 %v1838_v58, %v1903_v34 }
  0xdc   : > { %v558_v52 = vpop.permute.xlu0 %557  ;;  %v826_v26 = vadd.f32 %v772_v10, %v742_v20  ;;  %v827_v23 = vadd.f32 %v772_v10, %v743_v42  ;;  %v747_v42 = vadd.f32 %v723_v24, %v633_v33  ;;  %v1969_v10 = vmul.f32 %v1835_v57, %v1795_v38 }
  0xdd   : > { %v740_v54 = vadd.f32 %v716_v2, %v626_v50  ;;  %v830_v24 = vadd.f32 %v1885_v31, %v746_v49  ;;  %v741_v38 = vadd.f32 %v717_v39, %v627_v48  ;;  %v410_v19 = vmul.f32 %v1832_v56, %v1824_v51 }
  0xde   : > { %v1274_v17 = vmul.f32 -1.442695, %v826_v26  ;;  %v1275_v28 = vmul.f32 -1.442695, %v827_v23  ;;  %v831_v20 = vadd.f32 %v1885_v31, %v747_v42  ;;  %v612_v62 = vmul.f32 %v1887_v43, %v558_v52 }
  0xdf   : > { %v1905_v11 = vpop.permute.xlu1 %776  ;;  %v824_v34 = vadd.f32 %v1870_v18, %v740_v54  ;;  %v613_v36 = vmul.f32 %v1889_v47, %v558_v52  ;;  %v522_v9 = vadd.f32 %v498_v35, %v408_v6  ;;  %v1278_v26 = vmul.f32 -1.442695, %v830_v24 }
  0xe0   : > { %v1951_v7 = vpop.permute.xlu0 %573  ;;  %1376 = vpow2.f32 %v1274_v17  ;;  %v828_v23 = vadd.f32 %v1905_v11, %v1899_v63  ;;  %v411_v63 = vmul.f32 %v1835_v57, %v1824_v51  ;;  %v523_v31 = vadd.f32 %v499_v15, %v409_v40 }
  0xe1   : > { %1378 = vpow2.f32 %v1275_v28  ;;  %v825_v27 = vadd.f32 %v1870_v18, %v741_v38  ;;  %v520_v33 = vadd.f32 %v496_v44, %v406_v32  ;;  %v500_v49 = vmul.f32 %v1838_v58, %v1856_v8 }
  0xe2   : > { %v1276_v50 = vmul.f32 -1.442695, %v828_v23  ;;  %v1279_v52 = vmul.f32 -1.442695, %v831_v20  ;;  %v636_v2 = vadd.f32 %v612_v62, %v522_v9  ;;  %v521_v48 = vadd.f32 %v497_v25, %v407_v55 }
  0xe3   : > { %v1272_v51 = vmul.f32 -1.442695, %v824_v34  ;;  %v637_v17 = vadd.f32 %v613_v36, %v523_v31  ;;  %v829_v39 = vadd.f32 %v1905_v11, %v1901_v0  ;;  %v501_v6 = vmul.f32 %v1840_v59, %v1856_v8 }
  0xe4   : > { %v1909_v3 = vpop.permute.xlu1 %553  ;;  %1380 = vpow2.f32 %v1278_v26  ;;  %v1273_v42 = vmul.f32 -1.442695, %v825_v27  ;;  %v524_v55 = vadd.f32 %v500_v49, %v410_v19  ;;  %v502_v11 = vmul.f32 %v1838_v58, %v1907_v12 }
  0xe5   : > { %v672_v16 = vpop.permute.xlu0 %671  ;;  %v610_v18 = vmul.f32 %v1887_v43, %v1909_v3  ;;  %1382 = vpow2.f32 %v1276_v50  ;;  %v611_v54 = vmul.f32 %v1889_v47, %v1909_v3  ;;  %v1277_v35 = vmul.f32 -1.442695, %v829_v39 }
  0xe6   : > { %v726_v45 = vmul.f32 %v1881_v29, %v672_v16  ;;  %v727_v5 = vmul.f32 %v1883_v30, %v672_v16  ;;  %1384 = vpow2.f32 %v1279_v52  ;;  %v525_v16 = vadd.f32 %v501_v6, %v411_v63 }
  0xe7   : > { %1386 = vpow2.f32 %v1272_v51  ;;  %v634_v3 = vadd.f32 %v610_v18, %v520_v33  ;;  %v635_v19 = vadd.f32 %v611_v54, %v521_v48  ;;  %v526_v63 = vadd.f32 %v502_v11, %v1965_v37 }
  0xe8   : > { %v1911_v4 = vpop.permute.xlu1 %561  ;;  %v750_v40 = vadd.f32 %v726_v45, %v636_v2  ;;  %v751_v28 = vadd.f32 %v727_v5, %v637_v17  ;;  %1388 = vpow2.f32 %v1273_v42 }
  0xe9   : > { %v614_v0 = vmul.f32 %v1887_v43, %v1911_v4  ;;  %v615_v38 = vmul.f32 %v1889_v47, %v1911_v4  ;;  %v680_v25 = vpop.permute.xlu0 %679  ;;  %v503_v4 = vmul.f32 %v1840_v59, %v1907_v12  ;;  %1390 = vpow2.f32 %v1277_v35 }
  0xea   : > { %v834_v15 = vadd.f32 %v1897_v61, %v750_v40  ;;  %v835_v44 = vadd.f32 %v1897_v61, %v751_v28 }
  0xeb   : > { %v638_v62 = vadd.f32 %v614_v0, %v524_v55  ;;  %v639_v31 = vadd.f32 %v615_v38, %v525_v16  ;;  %v527_v17 = vadd.f32 %v503_v4, %v1969_v10  ;;  %v620_v4 = vmul.f32 %v1887_v43, %v1951_v7 }
  0xec   : > { %v1282_v45 = vmul.f32 -1.442695, %v834_v15  ;;  %v1283_v33 = vmul.f32 -1.442695, %v835_v44 }
  0xed   : > { %v1915_v14 = vpop.permute.xlu1 %667  ;;  %v1377_v20 = vpop.eup %1376 }
  0xee   : > { %v724_v8 = vmul.f32 %v1881_v29, %v1915_v14  ;;  %v725_v24 = vmul.f32 %v1883_v30, %v1915_v14  ;;  %v1379_v61 = vpop.eup %1378  ;;  %v878_v5 = vadd.f32 1.0, %v1377_v20  ;;  %1392 = vpow2.f32 %v1282_v45  ;;  %v2045_v39 = vpop.permute.xlu0 %683 }
  0xef   : > { %v879_v48 = vadd.f32 1.0, %v1379_v61  ;;  %1394 = vpow2.f32 %v1283_v33  ;;  %v506_v20 = vmul.f32 %v1838_v58, %v1913_v13  ;;  %v2071_v45 = vmul.f32 %v1835_v57, %v1817_v46 }
  0xf0   : > { %v748_v36 = vadd.f32 %v724_v8, %v634_v3  ;;  %v749_v26 = vadd.f32 %v725_v24, %v635_v19  ;;  %1396 = vrcp.f32 %v878_v5 }
  0xf1   : > { %v1381_v40 = vpop.eup %1380  ;;  %1398 = vrcp.f32 %v879_v48 }
  0xf2   : > { %v1926_v22 = vpop.permute.xlu1 %565  ;;  %v1383_v42 = vpop.eup %1382 }
  0xf3   : > { %v616_v14 = vmul.f32 %v1887_v43, %v1926_v22  ;;  %v617_v52 = vmul.f32 %v1889_v47, %v1926_v22  ;;  %v1385_v0 = vpop.eup %1384  ;;  %v692_v3 = vpop.permute.xlu0 %691 }
  0xf4   : > { %v1387_v8 = vpop.eup %1386  ;;  %v883_v33 = vadd.f32 1.0, %v1385_v0 }
  0xf5   : > { %v640_v12 = vadd.f32 %v616_v14, %v526_v63  ;;  %v641_v54 = vadd.f32 %v617_v52, %v527_v17  ;;  %v1389_v24 = vpop.eup %1388  ;;  %v876_v19 = vadd.f32 1.0, %v1387_v8  ;;  %v417_v14 = vmul.f32 %v1835_v57, %v1807_v41 }
  0xf6   : > { %v1391_v38 = vpop.eup %1390 }
  0xf7   : > { %v1943_v21 = vpop.permute.xlu1 %675  ;;  %v2067_v63 = vpop.permute.xlu0 %806 }
  0xf8   : > { %v728_v23 = vmul.f32 %v1881_v29, %v1943_v21  ;;  %v729_v34 = vmul.f32 %v1883_v30, %v1943_v21  ;;  %v730_v21 = vmul.f32 %v1881_v29, %v680_v25 }
  0xfa   : > { %v752_v50 = vadd.f32 %v728_v23, %v638_v62  ;;  %v753_v2 = vadd.f32 %v729_v34, %v639_v31  ;;  %v754_v55 = vadd.f32 %v730_v21, %v640_v12  ;;  %v877_v62 = vadd.f32 1.0, %v1389_v24 }
  0xfb   : > { %v507_v34 = vmul.f32 %v1840_v59, %v1913_v13  ;;  %v1393_v61 = vpop.eup %1392  ;;  %v621_v13 = vmul.f32 %v1889_v47, %v1951_v7 }
  0xfc   : > { %v1953_v53 = vpop.permute.xlu1 %786  ;;  %v1395_v31 = vpop.eup %1394 }
  0xfd   : > { %v832_v27 = vadd.f32 %v1953_v53, %v748_v36  ;;  %v833_v49 = vadd.f32 %v1953_v53, %v749_v26  ;;  %v731_v53 = vmul.f32 %v1883_v30, %v680_v25  ;;  %v416_v25 = vmul.f32 %v1832_v56, %v1807_v41 }
  0xfe   : > { %v881_v36 = vadd.f32 1.0, %v1391_v38  ;;  %v882_v41 = vadd.f32 1.0, %v1381_v40  ;;  %v531_v52 = vadd.f32 %v507_v34, %v417_v14 }
  0xff   : > { %v1280_v6 = vmul.f32 -1.442695, %v832_v27  ;;  %v1281_v22 = vmul.f32 -1.442695, %v833_v49  ;;  %v755_v15 = vadd.f32 %v731_v53, %v641_v54  ;;  %v2220_v27 = vld [vmem:[#allocation11_spill] sm:$0xff]  ;;  %v530_v5 = vadd.f32 %v506_v20, %v416_v25  ;;  %v1397_v49 = vpop.eup %1396  ;;  %v2221_v54 = vld [vmem:[#allocation12_spill] sm:$0xff] }
 0x100   : > { %v1978_v60 = vpop.permute.xlu1 %796  ;;  %v419_v7 = vmul.f32 %v1835_v57, %v2220_v27  ;;  %v645_v17 = vadd.f32 %v621_v13, %v531_v52  ;;  %v733_v53 = vmul.f32 %v1883_v30, %v2045_v39 }
 0x101   : > { %v836_v37 = vadd.f32 %v1978_v60, %v752_v50  ;;  %v837_v18 = vadd.f32 %v1978_v60, %v753_v2  ;;  %1400 = vpow2.f32 %v1280_v6  ;;  %v880_v60 = vadd.f32 1.0, %v1383_v42  ;;  %v1399_v2 = vpop.eup %1398 }
 0x102   : > { %1402 = vpow2.f32 %v1281_v22  ;;  %v418_v50 = vmul.f32 %v1832_v56, %v2220_v27  ;;  %v927_v6 = vadd.f32 1.0, %v1395_v31  ;;  %v956_v22 = vpop.permute.xlu0 %955 }
 0x103   : > { %v1284_v28 = vmul.f32 -1.442695, %v836_v37  ;;  %v1285_v10 = vmul.f32 -1.442695, %v837_v18  ;;  %v644_v37 = vadd.f32 %v620_v4, %v530_v5  ;;  %v732_v18 = vmul.f32 %v1881_v29, %v2045_v39 }
 0x104   : > { %v1997_v1 = vpop.permute.xlu1 %801  ;;  %v970_v38 = vmul.f32 %v1397_v49, %v956_v22 }
 0x105   : > { %v838_v11 = vadd.f32 %v1997_v1, %v754_v55  ;;  %1404 = vpow2.f32 %v1284_v28  ;;  %v839_v23 = vadd.f32 %v1997_v1, %v755_v15  ;;  %v2063_v1 = vmul.f32 %v1832_v56, %v1817_v46  ;;  %v2222_v55 = vld [vmem:[#allocation13_spill] sm:$0xff] }
 0x106   : > { %1406 = vpow2.f32 %v1285_v10  ;;  %v926_v56 = vadd.f32 1.0, %v1393_v61 }
 0x107   : > { %v1286_v16 = vmul.f32 -1.442695, %v838_v11  ;;  %1408 = vrcp.f32 %v880_v60  ;;  %v1287_v26 = vmul.f32 -1.442695, %v839_v23  ;;  %v737_v60 = vmul.f32 %v1883_v30, %v692_v3 }
 0x108   : > { %v971_v23 = vmul.f32 %v1399_v2, %v956_v22 }
 0x109   : > { %v2011_v32 = vpop.permute.xlu1 %463  ;;  %1410 = vpow2.f32 %v1286_v16 }
 0x10a   : > { %1412 = vrcp.f32 %v876_v19  ;;  %v508_v57 = vmul.f32 %v1838_v58, %v2011_v32  ;;  %v509_v24 = vmul.f32 %v1840_v59, %v2011_v32  ;;  %v961_v32 = vpop.permute.xlu0 %960 }
 0x10b   : > { %1414 = vrcp.f32 %v877_v62 }
 0x10c   : > { %1416 = vrcp.f32 %v881_v36  ;;  %v532_v62 = vadd.f32 %v508_v57, %v418_v50 }
 0x10d   : > { %1418 = vpow2.f32 %v1287_v26  ;;  %v533_v26 = vadd.f32 %v509_v24, %v419_v7 }
 0x10e   : > { %v2031_v9 = vpop.permute.xlu1 %569  ;;  %v1401_v48 = vpop.eup %1400  ;;  %1420 = vrcp.f32 %v882_v41 }
 0x10f   : > { %v618_v46 = vmul.f32 %v1887_v43, %v2031_v9  ;;  %v619_v12 = vmul.f32 %v1889_v47, %v2031_v9  ;;  %v1403_v40 = vpop.eup %1402  ;;  %1422 = vrcp.f32 %v883_v33  ;;  %v736_v9 = vmul.f32 %v1881_v29, %v692_v3 }
 0x110   : > { %1424 = vrcp.f32 %v926_v56  ;;  %v924_v39 = vadd.f32 1.0, %v1401_v48  ;;  %v925_v16 = vadd.f32 1.0, %v1403_v40 }
 0x111   : > { %v642_v28 = vadd.f32 %v618_v46, %v2221_v54  ;;  %v643_v0 = vadd.f32 %v619_v12, %v2222_v55  ;;  %1426 = vrcp.f32 %v927_v6 }
 0x112   : > { %v1405_v42 = vpop.eup %1404  ;;  %1428 = vrcp.f32 %v924_v39 }
 0x113   : > { %v2042_v51 = vpop.permute.xlu1 %467  ;;  %v1407_v15 = vpop.eup %1406  ;;  %v928_v20 = vadd.f32 1.0, %v1405_v42  ;;  %v756_v14 = vadd.f32 %v732_v18, %v642_v28  ;;  %v757_v3 = vadd.f32 %v733_v53, %v643_v0  ;;  %1430 = vrcp.f32 %v925_v16 }
 0x114   : > { %v1409_v19 = vpop.eup %1408  ;;  %v929_v4 = vadd.f32 1.0, %v1407_v15  ;;  %v510_v61 = vmul.f32 %v1838_v58, %v2042_v51 }
 0x115   : > { %v972_v31 = vmul.f32 %v1409_v19, %v961_v32  ;;  %1432 = vrcp.f32 %v928_v20  ;;  %v840_v2 = vadd.f32 %v2067_v63, %v756_v14  ;;  %v841_v58 = vadd.f32 %v2067_v63, %v757_v3 }
 0x116   : > { %v1411_v13 = vpop.eup %1410  ;;  %1434 = vrcp.f32 %v929_v4  ;;  %v534_v56 = vadd.f32 %v510_v61, %v2063_v1 }
 0x117   : > { %v1413_v5 = vpop.eup %1412 }
 0x118   : > { %v2050_v35 = vpop.permute.xlu1 %577  ;;  %v1415_v52 = vpop.eup %1414 }
 0x119   : > { %v622_v25 = vmul.f32 %v1887_v43, %v2050_v35  ;;  %v1417_v7 = vpop.eup %1416 }
 0x11a   : > { %v1419_v6 = vpop.eup %1418  ;;  %v973_v28 = vmul.f32 %v1417_v7, %v961_v32 }
 0x11b   : > { %v646_v33 = vadd.f32 %v622_v25, %v532_v62  ;;  %v1421_v40 = vpop.eup %1420  ;;  %v931_v55 = vadd.f32 1.0, %v1419_v6 }
 0x11c   : > { %v1423_v57 = vpop.eup %1422 }
 0x11d   : > { %v688_v44 = vpop.permute.xlu1 %687  ;;  %v760_v63 = vadd.f32 %v736_v9, %v646_v33  ;;  %v1425_v0 = vpop.eup %1424 }
 0x11e   : > { %v734_v8 = vmul.f32 %v1881_v29, %v688_v44  ;;  %v735_v10 = vmul.f32 %v1883_v30, %v688_v44  ;;  %v623_v44 = vmul.f32 %v1889_v47, %v2050_v35  ;;  %v511_v35 = vmul.f32 %v1840_v59, %v2042_v51 }
 0x11f   : > { %v994_v3 = vsub.f32 1.0, %v1425_v0 }
 0x120   : > { %v758_v34 = vadd.f32 %v734_v8, %v644_v37  ;;  %v759_v36 = vadd.f32 %v735_v10, %v645_v17  ;;  %v647_v49 = vadd.f32 %v623_v44, %v533_v26  ;;  %v930_v37 = vadd.f32 1.0, %v1411_v13  ;;  %v966_v8 = vpop.permute.xlu0 %965 }
 0x121   : > { %v535_v53 = vadd.f32 %v511_v35, %v2071_v45 }
 0x122   : > { %v2077_v21 = vpop.permute.xlu1 %581  ;;  %v761_v22 = vadd.f32 %v737_v60, %v647_v49  ;;  %v1427_v60 = vpop.eup %1426 }
 0x123   : > { %v624_v48 = vmul.f32 %v1887_v43, %v2077_v21  ;;  %v625_v59 = vmul.f32 %v1889_v47, %v2077_v21 }
 0x124   : > { %v1029_v35 = vpop.permute.xlu0 %1028 }
 0x125   : > { %v648_v47 = vadd.f32 %v624_v48, %v534_v56  ;;  %v649_v10 = vadd.f32 %v625_v59, %v535_v53 }
 0x127   : > { %v696_v11 = vpop.permute.xlu1 %695 }
 0x128   : > { %v738_v1 = vmul.f32 %v1881_v29, %v696_v11  ;;  %v739_v42 = vmul.f32 %v1883_v30, %v696_v11  ;;  %v974_v11 = vmul.f32 %v1421_v40, %v966_v8 }
 0x12a   : > { %v762_v24 = vadd.f32 %v738_v1, %v648_v47  ;;  %v763_v30 = vadd.f32 %v739_v42, %v649_v10 }
 0x12c   : > { %v812_v41 = vpop.permute.xlu1 %811 }
 0x12d   : > { %v842_v27 = vadd.f32 %v812_v41, %v758_v34  ;;  %v843_v50 = vadd.f32 %v812_v41, %v759_v36  ;;  %v995_v36 = vsub.f32 1.0, %v1427_v60 }
 0x12f   : > { %v978_v46 = vadd.f32 %v970_v38, %v842_v27  ;;  %v979_v12 = vadd.f32 %v971_v23, %v843_v50  ;;  %v1429_v38 = vpop.eup %1428  ;;  %v975_v23 = vmul.f32 %v1423_v57, %v966_v8 }
 0x130   : > { %v951_v17 = vpop.permute.xlu1 %950  ;;  %v1431_v20 = vpop.eup %1430  ;;  %v992_v41 = vsub.f32 1.0, %v1429_v38 }
 0x131   : > { %1436 = vtanh.f32 %v978_v46  ;;  %v968_v51 = vmul.f32 %v1413_v5, %v951_v17  ;;  %v969_v18 = vmul.f32 %v1415_v52, %v951_v17  ;;  %v1433_v62 = vpop.eup %1432  ;;  %v993_v27 = vsub.f32 1.0, %v1431_v20 }
 0x132   : > { %1438 = vtanh.f32 %v979_v12  ;;  %v1435_v14 = vpop.eup %1434  ;;  %v996_v12 = vsub.f32 1.0, %v1433_v62 }
 0x133   : > { %v976_v43 = vadd.f32 %v968_v51, %v840_v2  ;;  %v977_v54 = vadd.f32 %v969_v18, %v841_v58  ;;  %1440 = vrcp.f32 %v930_v37  ;;  %v997_v37 = vsub.f32 1.0, %v1435_v14 }
 0x134   : > { %v817_v21 = vpop.permute.xlu1 %816 }
 0x135   : > { %1442 = vtanh.f32 %v976_v43  ;;  %v844_v45 = vadd.f32 %v817_v21, %v760_v63  ;;  %v845_v9 = vadd.f32 %v817_v21, %v761_v22  ;;  %v1039_v43 = vpop.permute.xlu0 %1038 }
 0x136   : > { %1444 = vtanh.f32 %v977_v54 }
 0x137   : > { %v980_v39 = vadd.f32 %v972_v31, %v844_v45  ;;  %v981_v29 = vadd.f32 %v973_v28, %v845_v9  ;;  %1446 = vrcp.f32 %v931_v55 }
 0x138   : > { %v822_v15 = vpop.permute.xlu1 %821 }
 0x139   : > { %1448 = vtanh.f32 %v980_v39  ;;  %v846_v16 = vadd.f32 %v822_v15, %v762_v24  ;;  %v847_v19 = vadd.f32 %v822_v15, %v763_v30 }
 0x13a   : > { %1450 = vtanh.f32 %v981_v29 }
 0x13b   : > { %v982_v25 = vadd.f32 %v974_v11, %v846_v16  ;;  %v983_v44 = vadd.f32 %v975_v23, %v847_v19 }
 0x13c   : > { %v1024_v31 = vpop.permute.xlu1 %1023 }
 0x13d   : > { %1452 = vtanh.f32 %v982_v25 }
 0x13e   : > { %v1437_v34 = vpop.eup %1436  ;;  %1454 = vtanh.f32 %v983_v44 }
 0x13f   : > { %v1439_v32 = vpop.eup %1438  ;;  %v1002_v4 = vmul.f32 %v1437_v34, %v994_v3 }
 0x140   : > { %v1003_v26 = vmul.f32 %v1439_v32, %v995_v36  ;;  %v1441_v61 = vpop.eup %1440  ;;  %v1034_v59 = vpop.permute.xlu1 %1033 }
 0x141   : > { %1010 = vst [vmem:[%s2121_s25 + $0x10] sm:$0xff] %v1002_v4  ;;  %v1043_v46 = vmul.f32 %v1029_v35, %v1002_v4  ;;  %v998_v18 = vsub.f32 1.0, %v1441_v61 }
 0x142   : > { %v1443_v13 = vpop.eup %1442  ;;  %1011 = vst [vmem:[%s2121_s25 + $0x18] sm:$0xff] %v1003_v26  ;;  %v1044_v7 = vmul.f32 %v1029_v35, %v1003_v26 }
 0x143   : > { %v1445_v50 = vpop.eup %1444  ;;  %v1000_v5 = vmul.f32 %v1443_v13, %v992_v41 }
 0x144   : > { %v1001_v33 = vmul.f32 %v1445_v50, %v993_v27  ;;  %v1447_v49 = vpop.eup %1446 }
 0x145   : > { %1008 = vst [vmem:[%s2121_s25] sm:$0xff] %v1000_v5  ;;  %v1041_v52 = vmul.f32 %v1024_v31, %v1000_v5  ;;  %v999_v63 = vsub.f32 1.0, %v1447_v49 }
 0x146   : > { %v1449_v2 = vpop.eup %1448  ;;  %1009 = vst [vmem:[%s2121_s25 + $0x8] sm:$0xff] %v1001_v33  ;;  %v1042_v58 = vmul.f32 %v1024_v31, %v1001_v33 }
 0x147   : > { %v1451_v56 = vpop.eup %1450  ;;  %v1049_v48 = vadd.f32 %v1043_v46, %v1041_v52  ;;  %v1004_v17 = vmul.f32 %v1449_v2, %v996_v12 }
 0x148   : > { %v1058_v6 = vadd.f32 %v1044_v7, %v1042_v58  ;;  %v1005_v51 = vmul.f32 %v1451_v56, %v997_v37 }
 0x149   : > { %1012 = vst [vmem:[%s2121_s25 + $0x20] sm:$0xff] %v1004_v17  ;;  %v1045_v40 = vmul.f32 %v1034_v59, %v1004_v17 }
 0x14a   : > { %v1453_v53 = vpop.eup %1452  ;;  %1013 = vst [vmem:[%s2121_s25 + $0x28] sm:$0xff] %v1005_v51  ;;  %v1046_v22 = vmul.f32 %v1034_v59, %v1005_v51 }
 0x14b   : > { %v1455_v57 = vpop.eup %1454  ;;  %v1006_v1 = vmul.f32 %v1453_v53, %v998_v18  ;;  %v1050_v42 = vadd.f32 %v1049_v48, %v1045_v40 }
 0x14c   : > { %v1007_v54 = vmul.f32 %v1455_v57, %v999_v63  ;;  %v1059_v28 = vadd.f32 %v1058_v6, %v1046_v22 }
 0x14d   : > { %1014 = vst [vmem:[%s2121_s25 + $0x30] sm:$0xff] %v1006_v1  ;;  %v1047_v55 = vmul.f32 %v1039_v43, %v1006_v1 }
 0x14e   : > { %1015 = vst [vmem:[%s2121_s25 + $0x38] sm:$0xff] %v1007_v54  ;;  %v1048_v47 = vmul.f32 %v1039_v43, %v1007_v54 }
 0x14f   : > { %v1051_v21 = vadd.f32 %v1050_v42, %v1047_v55 }
 0x150   : > { %1477 = shalt.err (!%p1474_p3)
}
 0x151   : > { %s1478_s21 = scalar_lea.hbm %s2136_s15, 1024  ;;  %s1482_s25 = scalar_lea.hbm %s2208_s7, 2048 }
 0x152   : > { %p1479_p4 = scmp.ne.s32.totalorder %s2136_s15, %s1478_s21  ;;  %p1483_p9 = scmp.lt.s32.totalorder %s2136_s15, %s2208_s7 }
 0x153   : > { %p1484_p10 = scmp.lt.s32.totalorder %s1482_s25, %s1478_s21 }
 0x154   : > { %p1480_p7 = pnand %p1479_p4, %p1647_p5 }
 0x155   : > { %p1485_p11 = por %p1484_p10, %p1483_p9 }
 0x156   : > { %p1481_p8 = pneg %p1480_p7 }
 0x158   : > { %p1486_p12 = pnand %p1485_p11, %p1481_p8 }
 0x15a   : > { %1489 = shalt.err (!%p1486_p12)
}
 0x15b   : > { %s1561_s14 = smov 256   ;;  %s1562_s17 = smov 512   ;;  %v1060_v0 = vadd.f32 %v1059_v28, %v1048_v47  ;;  %v1052_v8 = vrot.slane %v1051_v21, 4  ;;  %v1070_v24 = vpop.permute.xlu1 %1069  ;;  %v2223_v23 = vld [vmem:[#allocation10_spill] sm:$0xff]  ;;  %v1564_v27 = vmov 1966171168   ;;  %v2225_v57 = vlaneseq }
 0x15c   : > { %s1563_s18 = smov 16   ;;  %v1075_v16 = vrot.slane %v1070_v24, %v2223_v23  ;;  %v1118_v50 = vunpack.c.l.s4 %v1564_v27  ;;  %v2224_v18 = vld [vmem:[#allocation9_spill] sm:$0xff]  ;;  %s1138_s24 = scalar_lea.sflag [#allocation4], %s2118_s23 }
 0x15d   : > { %1299 = dma.vmem_to_hbm [thread:$0]  (%p1647_p5), %s2130_s30, 1024, %s2136_s15, %s1143_s16, %s1561_s14, %s1562_s17, %s1563_s18   ;;  %v1061_v10 = vrot.slane %v1060_v0, 4  ;;  %v1053_v45 = vadd.f32 %v1052_v8, %v1051_v21  ;;  %vm1134_vm4 = vcmp.lt.s32.totalorder %v2225_v57, 256 }
 0x15e   : > { %v1119_v2 = vunpack.c.0.s8 %v1118_v50  ;;  %s1268_s30 = sshll.u32 %s2118_s23, 1  ;;  %s1296_s15 = sshll.u32 %s1630_s5, 5 }
 0x15f   : > { %v1062_v9 = vadd.f32 %v1061_v10, %v1060_v0  ;;  %v1054_v60 = vrot.slane %v1053_v45, 2  ;;  %s278_s16 = scalar_lea.vmem [#allocation3], %s1268_s30  ;;  %s1155_s22 = scalar_lea.hbm %s2207_s6, %s1296_s15 }
 0x160   : > { %v1122_v40 = vsub.s32 %v1119_v2, %v2224_v18  ;;  %s1157_s19 = sshll.u32 %s278_s16, 4  ;;  %s1565_s9 = smov [#allocation3]   ;;  %s1158_s19 = int_to_ptr.vmem [resolvable:$true] %s1157_s19 }
 0x161   : > { %v1063_v39 = vrot.slane %v1062_v9, 2  ;;  %v1055_v29 = vadd.f32 %v1054_v60, %v1053_v45  ;;  %s1490_s25 = scalar_lea.vmem %s1158_s19, 32  ;;  %s1494_s5 = sshll.u32 %s1565_s9, 4  ;;  %s1495_s5 = int_to_ptr.vmem [resolvable:$false] %s1494_s5 }
 0x162   : > { %p1491_p13 = scmp.ne.s32.totalorder %s1158_s19, %s1490_s25  ;;  %s1496_s10 = scalar_lea.vmem %s1495_s5, 64 }
 0x163   : > { %v1064_v30 = vadd.f32 %v1063_v39, %v1062_v9  ;;  %v1056_v11 = vrot.slane %v1055_v29, 1  ;;  %p1497_p2 = scmp.lt.s32.totalorder %s1158_s19, %s1495_s5  ;;  %p1498_p3 = scmp.lt.s32.totalorder %s1496_s10, %s1490_s25 }
 0x164   : > { %p1492_p0 = pnand %p1491_p13, %p1647_p5 }
 0x165   : > { %v1065_v15 = vrot.slane %v1064_v30, 1  ;;  %v1057_v38 = vadd.f32 %v1056_v11, %v1055_v29  ;;  %p1499_p4 = por %p1498_p3, %p1497_p2 }
 0x166   : > { %p1493_p1 = pneg %p1492_p0 }
 0x167   : > { %v1066_v19 = vadd.f32 %v1065_v15, %v1064_v30  ;;  %v1076_v20 = vadd.f32 %v1075_v16, %v1057_v38 }
 0x168   : > { %p1500_p7 = pnand %p1499_p4, %p1493_p1 }
 0x169   : > { %v1077_v62 = vadd.f32 %v1075_v16, %v1066_v19  ;;  %v1084_v25 = vand.u32 2147483647, %v1076_v20  ;;  %v1078_v58 = vmax.f32 %v1076_v20, 0.0  ;;  %vm1080_vm2 = vcmp.ne.f32.partialorder %v1076_v20, %v1076_v20 }
 0x16b   : > { %v1085_v44 = vand.u32 2147483647, %v1077_v62  ;;  %v1086_v14 = vsub.f32 0.0, %v1084_v25  ;;  %v1079_v56 = vmax.f32 %v1077_v62, 0.0  ;;  %vm1081_vm3 = vcmp.ne.f32.partialorder %v1077_v62, %v1077_v62 }
 0x16d   : > { %v1087_v3 = vsub.f32 0.0, %v1085_v44  ;;  %v1088_v34 = vmul.f32 1.442695, %v1086_v14 }
 0x16f   : > { %v1090_v36 = vmul.f32 1.442695, %v1087_v3  ;;  %1456 = vpow2.f32 %v1088_v34 }
 0x171   : > { %1458 = vpow2.f32 %v1090_v36 }
 0x17c   : > { %v1457_v32 = vpop.eup %1456 }
 0x17d   : > { %v1092_v26 = vadd.f32 1.0, %v1457_v32  ;;  %v1095_v41 = vmul.f32 -0.5, %v1457_v32  ;;  %v1098_v5 = vand.u32 2147483647, %v1457_v32 }
 0x17e   : > { %v1459_v4 = vpop.eup %1458 }
 0x17f   : > { %v1101_v61 = vadd.f32 1.0, %v1459_v4  ;;  %1460 = vlog2.f32 %v1092_v26  ;;  %v1104_v13 = vmul.f32 -0.5, %v1459_v4  ;;  %v1096_v31 = vadd.f32 1.0, %v1095_v41 }
 0x180   : > { %v1107_v33 = vand.u32 2147483647, %v1459_v4  ;;  %vm1099_vm0 = vcmp.lt.f32.partialorder %v1098_v5, 0.0004427343 }
 0x181   : > { %1462 = vlog2.f32 %v1101_v61  ;;  %v1105_v35 = vadd.f32 1.0, %v1104_v13  ;;  %v1097_v12 = vmul.f32 %v1457_v32, %v1096_v31 }
 0x182   : > { %vm1108_vm1 = vcmp.lt.f32.partialorder %v1107_v33, 0.0004427343 }
 0x183   : > { %v1106_v37 = vmul.f32 %v1459_v4, %v1105_v35 }
 0x18c   : > { %v1461_v49 = vpop.eup %1460 }
 0x18d   : > { %v1094_v46 = vmul.f32 0.6931472, %v1461_v49 }
 0x18e   : > { %v1463_v52 = vpop.eup %1462 }
 0x18f   : > { %v1103_v7 = vmul.f32 0.6931472, %v1463_v52  ;;  %v1100_v48 = vsel %vm1099_vm0, %v1097_v12, %v1094_v46 }
 0x190   : > { %v1110_v6 = vadd.f32 %v1100_v48, %v1078_v58 }
 0x191   : > { %v1109_v17 = vsel %vm1108_vm1, %v1106_v37, %v1103_v7 }
 0x192   : > { %v1111_v59 = vadd.f32 %v1109_v17, %v1079_v56  ;;  %v1112_v51 = vsel %vm1080_vm2, %v1076_v20, %v1110_v6 }
 0x194   : > { %v1113_v53 = vsel %vm1081_vm3, %v1077_v62, %v1111_v59 }
 0x195   : > { %v1116_v63 = vcombine.low %v1112_v51, %v1113_v53 }
 0x197   : > { %v1123_v22 = vrot.slane %v1116_v63, %v1122_v40 }
 0x199   : > { %v1130_v1 = vrot.slane %v1123_v22, %v1122_v40 }
 0x19b   : > { %1136 = vst.msk [vmem:[%s278_s16] sm:$0x3] %vm1134_vm4, %v1130_v1 }
 0x19c   : > { %1503 = shalt.err (!%p1500_p7)
}
 0x19d   : > { %s1504_s14 = scalar_lea.hbm %s1155_s22, 32  ;;  %s1508_s18 = scalar_lea.hbm %s2207_s6, 64 }
 0x19e   : > { %p1505_p8 = scmp.ne.s32.totalorder %s1155_s22, %s1504_s14  ;;  %p1509_p11 = scmp.lt.s32.totalorder %s1155_s22, %s2207_s6 }
 0x19f   : > { %p1510_p12 = scmp.lt.s32.totalorder %s1508_s18, %s1504_s14 }
 0x1a0   : > { %p1506_p9 = pnand %p1505_p8, %p1647_p5 }
 0x1a1   : > { %p1511_p13 = por %p1510_p12, %p1509_p11 }
 0x1a2   : > { %p1507_p10 = pneg %p1506_p9 }
 0x1a4   : > { %p1512_p0 = pnand %p1511_p13, %p1507_p10 }
 0x1a6   : > { %1515 = shalt.err (!%p1512_p0)
}
 0x1a7   : > { %1298 = dma.vmem_to_hbm [thread:$0]  (%p1647_p5), %s1158_s19, 32, %s1155_s22, %s1138_s24  }
 0x1a8 PF: > { %p1309_p1 = scmp.ge.s32.totalorder %s1554_s29, 2  ;;  %s1185_s16 = sand.u32 1, %s1542_s26  }
 0x1a9   : > { %s1186_s20 = scalar_lea.sflag [#allocation4], %s1185_s16 }
 0x1aa   : > { %p1303_p2 = pnand %p1309_p1, %p1651_p6 }
 0x1ac   : > { %p1304_p3 = pneg %p1303_p2 }
 0x1ae   : > { %1533 = dma.done.wait (%p1304_p3), %s1186_s20, 32  }
 0x1af   : > { %1535 = vsyncadd (%p1304_p3), %s1186_s20, 4294967264  ;;  %s1195_s21 = scalar_lea.sflag [#allocation6], %s1185_s16 }
 0x1b0   : > { %1537 = dma.done.wait (%p1304_p3), %s1195_s21, 1024  }
 0x1b1   : > { %1539 = vsyncadd (%p1304_p3), %s1195_s21, 4294966272  ;;  %p23_p5 = scmp.ge.s32.totalorder %s1634_s8, 4   ;;  %s2226_s26 = smov %s1546_s27 }
 0x1b2   : > { %s2227_s27 = smov %s1550_s28  ;;  %s2228_s28 = smov %s1645_s11 }
 0x1b3   : > { %s2229_s29 = smov %s1634_s8  ;;  %25 = sbr.rel (!%p23_p5) target bundleno = 8 (0x8), region = 96 }
 0x1b8   :  { %1200 = vsyncpa [#allocation4], 1 }
 0x1b9   :  { %1202 = vsyncpa [#allocation4 + $0x1], 1 }
 0x1ba   :  { %1203 = vsyncpa [#allocation6], 1 }
 0x1bb   :  { %1205 = vsyncpa [#allocation6 + $0x1], 1 }

</bundles_post_ra>
